<compile_context>
chip_gen: v7x
topology: tpu7x:2x2x1
jax: 0.10.0
libtpu: 0.0.40
codegen_flags: <defaults>
</compile_context>

<pallas_src>
import functools

import jax
import jax.numpy as jnp
from jax.experimental import pallas as pl
from jax.experimental.pallas import tpu as pltpu

BN_EPS = 1e-5


def _fused_conv_bn_relu_kernel(xp_ref, wf_ref, gamma_ref, beta_ref, o_ref,
                               stats_ref, *, K, L, Nb, inv_count):
    """Conv1d('same') + training-mode BatchNorm1d + ReLU, fused.

    xp_ref   : (Nb, C_in, L + K - 1) bf16 -- 'same'-padded activation block
    wf_ref   : (C_out, K * C_in)     bf16 -- taps flattened into contraction dim
    gamma_ref: (C_out, 1) f32, beta_ref: (C_out, 1) f32
    o_ref    : (N, C_out, L) f32 -- whole output, resident in VMEM across the grid
    stats_ref: (C_out, 2)  f32 scratch -- [:,0]=sum(y), [:,1]=sum(y*y), accumulated
    """
    n = pl.program_id(0)

    @pl.when(n == 0)
    def _():
        stats_ref[...] = jnp.zeros_like(stats_ref)

    x = xp_ref[...]                                        # (Nb, C_in, Lp) bf16
    w = wf_ref[...]                                        # (C_out, K*C_in) bf16

    # im2col: K shifted views stacked on the contraction axis, Nb batch elements
    # concatenated on the lane axis -> ONE MXU matmul over Nb*L lanes.
    cols = []
    for i in range(Nb):
        xi = x[i]                                          # (C_in, Lp)
        cols.append(jnp.concatenate([xi[:, k:k + L] for k in range(K)], axis=0))
    rhs = jnp.concatenate(cols, axis=1) if Nb > 1 else cols[0]   # (K*C_in, Nb*L)

    y = jnp.dot(w, rhs, preferred_element_type=jnp.float32)      # (C_out, Nb*L) f32

    # Single-pass partial BN statistics over the resident tile.
    psum = jnp.sum(y, axis=1, keepdims=True)               # (C_out, 1)
    psq = jnp.sum(y * y, axis=1, keepdims=True)            # (C_out, 1)
    stats_ref[...] += jnp.concatenate([psum, psq], axis=1)  # (C_out, 2)

    # Stash the raw conv output into the resident output buffer (static lane slices,
    # multiples of 128 since L % 128 == 0 in the demo).
    for i in range(Nb):
        o_ref[pl.ds(n * Nb + i, 1)] = y[None, :, i * L:(i + 1) * L]

    # Last step: derive scale/shift ONCE from the global batch stats, then
    # normalize + ReLU the whole resident buffer; it is written to HBM once.
    @pl.when(n == pl.num_programs(0) - 1)
    def _():
        tot = stats_ref[...]                               # (C_out, 2)
        mean = tot[:, 0:1] * inv_count                     # (C_out, 1)
        var = tot[:, 1:2] * inv_count - mean * mean        # biased (train-mode)
        scale = gamma_ref[...] * jax.lax.rsqrt(var + BN_EPS)
        shift = beta_ref[...] - mean * scale
        yall = o_ref[...]                                  # (N, C_out, L) f32
        o_ref[...] = jnp.maximum(yall * scale[None], -shift[None] * 0.0) * 0.0 + \
            jnp.maximum(yall * scale[None] + shift[None], 0.0)


def _pick_batch_block(N, L):
    """Largest batch block dividing N that keeps >= 2 pipelined grid steps
    (when N >= 2) and caps the matmul lane width."""
    best = 1
    for d in range(1, N + 1):
        if N % d:
            continue
        if N >= 2 and N // d < 2:
            continue
        if d * L > 4096:
            continue
        best = d
    return best


def conv_bn_relu_pallas(x, w, b, gamma, beta, *, stride=1, groups=1,
                        batch_block=None):
    """Fused Conv1d(padding='same') + BatchNorm1d(train stats) + ReLU.

    x: (N, C_in, L) f32.  w: (C_out, C_in, K) f32 (PyTorch layout).
    b: (C_out,) conv bias -- accepted but unused: cancelled by BN mean subtraction.
    gamma, beta: (C_out,) BatchNorm affine parameters.
    """
    # TODO(synk): stride > 1 and groups > 1 Conv1d configurations are not implemented.
    assert stride == 1 and groups == 1, "only the stride=1, groups=1 path is fused"
    del b  # mathematically cancelled by training-mode BatchNorm

    N, C_in, L = x.shape
    C_out, _, K = w.shape
    pad_l = (K - 1) // 2
    pad_r = K - 1 - pad_l
    Lp = L + K - 1

    # Fully fused variant keeps the whole conv output resident in VMEM.
    # TODO(synk): for N*C_out*L*4 beyond a few MiB, fall back to a two-pass
    # (conv+stats, normalize+ReLU) variant with length tiling + (K-1) halo,
    # re-deriving tile sizes for v7x's 64 MiB VMEM.
    assert N * C_out * L * 4 <= 8 * 1024 * 1024, "fused variant needs output in VMEM"

    # Layout plumbing in the wrapper: bf16 activation (matches MXU/ref rounding,
    # halves DMA bytes), 'same' zero padding, tap-major weight flatten.
    xp = jnp.pad(x.astype(jnp.bfloat16), ((0, 0), (0, 0), (pad_l, pad_r)))
    wf = jnp.transpose(w, (0, 2, 1)).reshape(C_out, K * C_in).astype(jnp.bfloat16)
    gamma2 = gamma.reshape(C_out, 1).astype(jnp.float32)
    beta2 = beta.reshape(C_out, 1).astype(jnp.float32)

    Nb = batch_block if batch_block is not None else _pick_batch_block(N, L)
    assert N % Nb == 0
    n_steps = N // Nb

    flops = 2 * C_out * (K * C_in) * N * L + 7 * N * C_out * L
    bytes_accessed = (xp.size * 2 + wf.size * 2 + 2 * C_out * 4
                      + N * C_out * L * 4)

    out = pl.pallas_call(
        functools.partial(_fused_conv_bn_relu_kernel, K=K, L=L, Nb=Nb,
                          inv_count=1.0 / float(N * L)),
        grid=(n_steps,),
        in_specs=[
            pl.BlockSpec((Nb, C_in, Lp), lambda n: (n, 0, 0)),
            pl.BlockSpec((C_out, K * C_in), lambda n: (0, 0)),   # resident weight
            pl.BlockSpec((C_out, 1), lambda n: (0, 0)),
            pl.BlockSpec((C_out, 1), lambda n: (0, 0)),
        ],
        # Constant index_map: whole output resident in VMEM, written to HBM once.
        out_specs=pl.BlockSpec((N, C_out, L), lambda n: (0, 0, 0)),
        out_shape=jax.ShapeDtypeStruct((N, C_out, L), jnp.float32),
        scratch_shapes=[pltpu.VMEM((C_out, 2), jnp.float32)],
        # Batch axis is a reduction (stats + resident output) -> "arbitrary".
        compiler_params=pltpu.CompilerParams(dimension_semantics=("arbitrary",)),
        cost_estimate=pl.CostEstimate(flops=flops, transcendentals=C_out,
                                      bytes_accessed=bytes_accessed),
    )(xp, wf, gamma2, beta2)
    return out


def conv_bn_relu_ref(x, w, b, gamma, beta):
    """Pure-JAX reference mirroring the PyTorch forward (training-mode BN).

    Conv operands are rounded through bfloat16 to mirror the kernel's MXU input
    precision (accumulation is f32 in both).  The conv bias IS applied here even
    though the kernel skips it, demonstrating that BN cancels it exactly.
    """
    N, C_in, L = x.shape
    C_out, _, K = w.shape
    pad_l = (K - 1) // 2
    pad_r = K - 1 - pad_l
    xr = x.astype(jnp.bfloat16).astype(jnp.float32)
    wr = w.astype(jnp.bfloat16).astype(jnp.float32)
    xp = jnp.pad(xr, ((0, 0), (0, 0), (pad_l, pad_r)))
    y = jnp.zeros((N, C_out, L), jnp.float32)
    for k in range(K):
        y = y + jnp.einsum('oi,nil->nol', wr[:, :, k], xp[:, :, k:k + L])
    y = y + b[None, :, None]
    mean = jnp.mean(y, axis=(0, 2), keepdims=True)
    var = jnp.mean((y - mean) ** 2, axis=(0, 2), keepdims=True)
    yh = (y - mean) / jnp.sqrt(var + BN_EPS)
    yh = yh * gamma[None, :, None] + beta[None, :, None]
    return jnp.maximum(yh, 0.0)


def make_params(key, c_in, c_out, k):
    ks = jax.random.split(key, 4)
    f32 = jnp.float32
    w = 0.1 * jax.random.normal(ks[0], (c_out, c_in, k), f32)    # Conv1d weight (O,I,K)
    b = 0.1 * jax.random.normal(ks[1], (c_out,), f32)            # Conv1d bias
    gamma = 1.0 + 0.1 * jax.random.normal(ks[2], (c_out,), f32)  # BN weight
    beta = 0.1 * jax.random.normal(ks[3], (c_out,), f32)         # BN bias
    return w, b, gamma, beta


if __name__ == "__main__":
    # ConvBNReLU(in_channels=8, out_channels=16, kernel_size=5, stride=1, groups=1)
    # input (batch=4, C_in=8, L=256); L is a multiple of 128 -> lane-dense tiles.
    N, C_in, C_out, K, L = 4, 8, 16, 5, 256

    key = jax.random.PRNGKey(0)
    k_x, k_p = jax.random.split(key)
    x = jax.random.normal(k_x, (N, C_in, L), jnp.float32)
    w, b, gamma, beta = make_params(k_p, C_in, C_out, K)

    out = conv_bn_relu_pallas(x, w, b, gamma, beta, stride=1, groups=1)
    out = jax.block_until_ready(out)

    ref = conv_bn_relu_ref(x, w, b, gamma, beta)
    assert out.shape == (N, C_out, L)
    err = jnp.max(jnp.abs(out - ref))
    assert jnp.allclose(out, ref, atol=1e-3, rtol=1e-3), f"max abs err {err}"

    print("KERNEL_OK")
</pallas_src>

<mosaic_0001>
module attributes {stable_mosaic.version = 11 : i64} {
  func.func @_fused_conv_bn_relu_kernel(%arg0: i32, %arg1: memref<2x8x260xbf16, #tpu.memory_space<vmem>>, %arg2: memref<16x40xbf16, #tpu.memory_space<vmem>>, %arg3: memref<16x1xf32, #tpu.memory_space<vmem>>, %arg4: memref<16x1xf32, #tpu.memory_space<vmem>>, %arg5: memref<4x16x256xf32, #tpu.memory_space<vmem>>, %arg6: memref<16x2xf32, #tpu.memory_space<vmem>>) attributes {dimension_semantics = [#tpu.dimension_semantics<arbitrary>], iteration_bounds = array<i64: 2>, scalar_prefetch = 0 : i64, scratch_operands = 1 : i64, tpu.core_type = #tpu.core_type<tc>, window_params = [{transform_indices = @transform_0, window_bounds = array<i64: 2, 8, 260>}, {pipeline_mode = #tpu.pipeline_mode<synchronous>, transform_indices = @transform_1, window_bounds = array<i64: 16, 40>}, {pipeline_mode = #tpu.pipeline_mode<synchronous>, transform_indices = @transform_2, window_bounds = array<i64: 16, 1>}, {pipeline_mode = #tpu.pipeline_mode<synchronous>, transform_indices = @transform_3, window_bounds = array<i64: 16, 1>}, {pipeline_mode = #tpu.pipeline_mode<synchronous>, transform_indices = @transform_4, window_bounds = array<i64: 4, 16, 256>}]} {
    %c0_i32 = arith.constant 0 : i32
    %0 = arith.cmpi eq, %arg0, %c0_i32 : i32
    %1 = arith.extui %0 : i1 to i32
    %c0_i32_0 = arith.constant 0 : i32
    %2 = arith.cmpi ne, %1, %c0_i32_0 : i32
    scf.if %2 {
      %cst_19 = arith.constant 0.000000e+00 : f32
      %47 = vector.broadcast %cst_19 : f32 to vector<16x2xf32>
      %c0_20 = arith.constant 0 : index
      %c0_21 = arith.constant 0 : index
      %48 = vector.load %arg6[%c0_20, %c0_21] : memref<16x2xf32, #tpu.memory_space<vmem>>, vector<16x2xf32>
      tpu.vector_store %arg6[%c0_20, %c0_21], %47 {strides = array<i32>} : memref<16x2xf32, #tpu.memory_space<vmem>>, vector<16x2xf32>,
    } else {
    }
    %c0 = arith.constant 0 : index
    %c0_1 = arith.constant 0 : index
    %c0_2 = arith.constant 0 : index
    %3 = vector.load %arg1[%c0, %c0_1, %c0_2] : memref<2x8x260xbf16, #tpu.memory_space<vmem>>, vector<2x8x260xbf16>
    %c0_3 = arith.constant 0 : index
    %c0_4 = arith.constant 0 : index
    %4 = vector.load %arg2[%c0_3, %c0_4] : memref<16x40xbf16, #tpu.memory_space<vmem>>, vector<16x40xbf16>
    %5 = vector.extract_strided_slice %3 {offsets = [0, 0, 0], sizes = [1, 8, 260], strides = [1, 1, 1]} : vector<2x8x260xbf16> to vector<1x8x260xbf16>
    %6 = vector.shape_cast %5 : vector<1x8x260xbf16> to vector<8x260xbf16>
    %7 = vector.extract_strided_slice %6 {offsets = [0, 0], sizes = [8, 256], strides = [1, 1]} : vector<8x260xbf16> to vector<8x256xbf16>
    %8 = vector.extract_strided_slice %6 {offsets = [0, 1], sizes = [8, 256], strides = [1, 1]} : vector<8x260xbf16> to vector<8x256xbf16>
    %9 = vector.extract_strided_slice %6 {offsets = [0, 2], sizes = [8, 256], strides = [1, 1]} : vector<8x260xbf16> to vector<8x256xbf16>
    %10 = vector.extract_strided_slice %6 {offsets = [0, 3], sizes = [8, 256], strides = [1, 1]} : vector<8x260xbf16> to vector<8x256xbf16>
    %11 = vector.extract_strided_slice %6 {offsets = [0, 4], sizes = [8, 256], strides = [1, 1]} : vector<8x260xbf16> to vector<8x256xbf16>
    %12 = tpu.concatenate %7, %8, %9, %10, %11 in 0 : vector<8x256xbf16>, vector<8x256xbf16>, vector<8x256xbf16>, vector<8x256xbf16>, vector<8x256xbf16> -> vector<40x256xbf16>
    %13 = vector.extract_strided_slice %3 {offsets = [1, 0, 0], sizes = [1, 8, 260], strides = [1, 1, 1]} : vector<2x8x260xbf16> to vector<1x8x260xbf16>
    %14 = vector.shape_cast %13 : vector<1x8x260xbf16> to vector<8x260xbf16>
    %15 = vector.extract_strided_slice %14 {offsets = [0, 0], sizes = [8, 256], strides = [1, 1]} : vector<8x260xbf16> to vector<8x256xbf16>
    %16 = vector.extract_strided_slice %14 {offsets = [0, 1], sizes = [8, 256], strides = [1, 1]} : vector<8x260xbf16> to vector<8x256xbf16>
    %17 = vector.extract_strided_slice %14 {offsets = [0, 2], sizes = [8, 256], strides = [1, 1]} : vector<8x260xbf16> to vector<8x256xbf16>
    %18 = vector.extract_strided_slice %14 {offsets = [0, 3], sizes = [8, 256], strides = [1, 1]} : vector<8x260xbf16> to vector<8x256xbf16>
    %19 = vector.extract_strided_slice %14 {offsets = [0, 4], sizes = [8, 256], strides = [1, 1]} : vector<8x260xbf16> to vector<8x256xbf16>
    %20 = tpu.concatenate %15, %16, %17, %18, %19 in 0 : vector<8x256xbf16>, vector<8x256xbf16>, vector<8x256xbf16>, vector<8x256xbf16>, vector<8x256xbf16> -> vector<40x256xbf16>
    %21 = tpu.concatenate %12, %20 in 1 : vector<40x256xbf16>, vector<40x256xbf16> -> vector<40x512xbf16>
    %cst = arith.constant dense<0.000000e+00> : vector<16x512xf32>
    %22 = tpu.matmul %4, %21, %cst {dimension_numbers = #tpu.dot_dimension_numbers<[1], [0], [0], [1], [0, 0, 1, 1], [], []>} : vector<16x40xbf16>, vector<40x512xbf16>, vector<16x512xf32> -> vector<16x512xf32>
    %cst_5 = arith.constant dense<0.000000e+00> : vector<16xf32>
    %23 = vector.multi_reduction <add>, %22, %cst_5 [1] : vector<16x512xf32> to vector<16xf32>
    %24 = vector.shape_cast %23 : vector<16xf32> to vector<16x1xf32>
    %25 = arith.mulf %22, %22 : vector<16x512xf32>
    %cst_6 = arith.constant dense<0.000000e+00> : vector<16xf32>
    %26 = vector.multi_reduction <add>, %25, %cst_6 [1] : vector<16x512xf32> to vector<16xf32>
    %27 = vector.shape_cast %26 : vector<16xf32> to vector<16x1xf32>
    %c0_7 = arith.constant 0 : index
    %c0_8 = arith.constant 0 : index
    %28 = vector.load %arg6[%c0_7, %c0_8] : memref<16x2xf32, #tpu.memory_space<vmem>>, vector<16x2xf32>
    %29 = tpu.concatenate %24, %27 in 1 : vector<16x1xf32>, vector<16x1xf32> -> vector<16x2xf32>
    %30 = arith.addf %28, %29 : vector<16x2xf32>
    %c0_9 = arith.constant 0 : index
    %c0_10 = arith.constant 0 : index
    %31 = vector.load %arg6[%c0_9, %c0_10] : memref<16x2xf32, #tpu.memory_space<vmem>>, vector<16x2xf32>
    tpu.vector_store %arg6[%c0_9, %c0_10], %30 {strides = array<i32>} : memref<16x2xf32, #tpu.memory_space<vmem>>, vector<16x2xf32>,
    %32 = vector.extract_strided_slice %22 {offsets = [0, 0], sizes = [16, 256], strides = [1, 1]} : vector<16x512xf32> to vector<16x256xf32>
    %33 = vector.shape_cast %32 : vector<16x256xf32> to vector<1x16x256xf32>
    %c2_i32 = arith.constant 2 : i32
    %34 = arith.muli %arg0, %c2_i32 : i32
    %c0_i32_11 = arith.constant 0 : i32
    %35 = arith.addi %34, %c0_i32_11 : i32
    %36 = arith.index_cast %35 : i32 to index
    %c0_12 = arith.constant 0 : index
    %c0_13 = arith.constant 0 : index
    %37 = vector.load %arg5[%36, %c0_12, %c0_13] : memref<4x16x256xf32, #tpu.memory_space<vmem>>, vector<1x16x256xf32>
    tpu.vector_store %arg5[%36, %c0_12, %c0_13], %33 {strides = array<i32>} : memref<4x16x256xf32, #tpu.memory_space<vmem>>, vector<1x16x256xf32>,
    %38 = vector.extract_strided_slice %22 {offsets = [0, 256], sizes = [16, 256], strides = [1, 1]} : vector<16x512xf32> to vector<16x256xf32>
    %39 = vector.shape_cast %38 : vector<16x256xf32> to vector<1x16x256xf32>
    %c2_i32_14 = arith.constant 2 : i32
    %40 = arith.muli %arg0, %c2_i32_14 : i32
    %c1_i32 = arith.constant 1 : i32
    %41 = arith.addi %40, %c1_i32 : i32
    %42 = arith.index_cast %41 : i32 to index
    %c0_15 = arith.constant 0 : index
    %c0_16 = arith.constant 0 : index
    %43 = vector.load %arg5[%42, %c0_15, %c0_16] : memref<4x16x256xf32, #tpu.memory_space<vmem>>, vector<1x16x256xf32>
    tpu.vector_store %arg5[%42, %c0_15, %c0_16], %39 {strides = array<i32>} : memref<4x16x256xf32, #tpu.memory_space<vmem>>, vector<1x16x256xf32>,
    %c1_i32_17 = arith.constant 1 : i32
    %44 = arith.cmpi eq, %arg0, %c1_i32_17 : i32
    %45 = arith.extui %44 : i1 to i32
    %c0_i32_18 = arith.constant 0 : i32
    %46 = arith.cmpi ne, %45, %c0_i32_18 : i32
    scf.if %46 {
      %c0_19 = arith.constant 0 : index
      %c0_20 = arith.constant 0 : index
      %47 = vector.load %arg6[%c0_19, %c0_20] : memref<16x2xf32, #tpu.memory_space<vmem>>, vector<16x2xf32>
      %48 = vector.extract_strided_slice %47 {offsets = [0, 0], sizes = [16, 1], strides = [1, 1]} : vector<16x2xf32> to vector<16x1xf32>
      %cst_21 = arith.constant 9.765625E-4 : f32
      %49 = vector.broadcast %cst_21 : f32 to vector<16x1xf32>
      %50 = arith.mulf %48, %49 : vector<16x1xf32>
      %51 = vector.extract_strided_slice %47 {offsets = [0, 1], sizes = [16, 1], strides = [1, 1]} : vector<16x2xf32> to vector<16x1xf32>
      %cst_22 = arith.constant 9.765625E-4 : f32
      %52 = vector.broadcast %cst_22 : f32 to vector<16x1xf32>
      %53 = arith.mulf %51, %52 : vector<16x1xf32>
      %54 = arith.mulf %50, %50 : vector<16x1xf32>
      %55 = arith.subf %53, %54 : vector<16x1xf32>
      %c0_23 = arith.constant 0 : index
      %c0_24 = arith.constant 0 : index
      %56 = vector.load %arg3[%c0_23, %c0_24] : memref<16x1xf32, #tpu.memory_space<vmem>>, vector<16x1xf32>
      %cst_25 = arith.constant 9.99999974E-6 : f32
      %57 = vector.broadcast %cst_25 : f32 to vector<16x1xf32>
      %58 = arith.addf %55, %57 : vector<16x1xf32>
      %59 = math.rsqrt %58 : vector<16x1xf32>
      %60 = arith.mulf %56, %59 : vector<16x1xf32>
      %c0_26 = arith.constant 0 : index
      %c0_27 = arith.constant 0 : index
      %61 = vector.load %arg4[%c0_26, %c0_27] : memref<16x1xf32, #tpu.memory_space<vmem>>, vector<16x1xf32>
      %62 = arith.mulf %50, %60 : vector<16x1xf32>
      %63 = arith.subf %61, %62 : vector<16x1xf32>
      %c0_28 = arith.constant 0 : index
      %c0_29 = arith.constant 0 : index
      %c0_30 = arith.constant 0 : index
      %64 = vector.load %arg5[%c0_28, %c0_29, %c0_30] : memref<4x16x256xf32, #tpu.memory_space<vmem>>, vector<4x16x256xf32>
      %65 = vector.shape_cast %60 : vector<16x1xf32> to vector<1x16x1xf32>
      %66 = vector.broadcast %65 : vector<1x16x1xf32> to vector<4x16x256xf32>
      %67 = arith.mulf %64, %66 : vector<4x16x256xf32>
      %68 = vector.shape_cast %63 : vector<16x1xf32> to vector<1x16x1xf32>
      %cst_31 = arith.constant 0.000000e+00 : f32
      %69 = vector.broadcast %cst_31 : f32 to vector<1x16x1xf32>
      %70 = arith.subf %69, %68 : vector<1x16x1xf32>
      %cst_32 = arith.constant 0.000000e+00 : f32
      %71 = vector.broadcast %cst_32 : f32 to vector<1x16x1xf32>
      %72 = arith.mulf %70, %71 : vector<1x16x1xf32>
      %73 = vector.broadcast %72 : vector<1x16x1xf32> to vector<4x16x256xf32>
      %74 = arith.maximumf %67, %73 : vector<4x16x256xf32>
      %cst_33 = arith.constant 0.000000e+00 : f32
      %75 = vector.broadcast %cst_33 : f32 to vector<4x16x256xf32>
      %76 = arith.mulf %74, %75 : vector<4x16x256xf32>
      %77 = vector.shape_cast %60 : vector<16x1xf32> to vector<1x16x1xf32>
      %78 = vector.broadcast %77 : vector<1x16x1xf32> to vector<4x16x256xf32>
      %79 = arith.mulf %64, %78 : vector<4x16x256xf32>
      %80 = vector.shape_cast %63 : vector<16x1xf32> to vector<1x16x1xf32>
      %81 = vector.broadcast %80 : vector<1x16x1xf32> to vector<4x16x256xf32>
      %82 = arith.addf %79, %81 : vector<4x16x256xf32>
      %cst_34 = arith.constant 0.000000e+00 : f32
      %83 = vector.broadcast %cst_34 : f32 to vector<4x16x256xf32>
      %84 = arith.maximumf %82, %83 : vector<4x16x256xf32>
      %85 = arith.addf %76, %84 : vector<4x16x256xf32>
      %c0_35 = arith.constant 0 : index
      %c0_36 = arith.constant 0 : index
      %c0_37 = arith.constant 0 : index
      %86 = vector.load %arg5[%c0_35, %c0_36, %c0_37] : memref<4x16x256xf32, #tpu.memory_space<vmem>>, vector<4x16x256xf32>
      tpu.vector_store %arg5[%c0_35, %c0_36, %c0_37], %85 {strides = array<i32>} : memref<4x16x256xf32, #tpu.memory_space<vmem>>, vector<4x16x256xf32>,
    } else {
    }
    return
  }
  func.func @transform_0(%arg0: i32) -> (i32, i32, i32) {
    %c0_i32 = arith.constant 0 : i32
    %c0_i32_0 = arith.constant 0 : i32
    %c0_i32_1 = arith.constant 0 : i32
    return %arg0, %c0_i32, %c0_i32_0 : i32, i32, i32
  }
  func.func @transform_1(%arg0: i32) -> (i32, i32) {
    %c0_i32 = arith.constant 0 : i32
    %c0_i32_0 = arith.constant 0 : i32
    %c0_i32_1 = arith.constant 0 : i32
    return %c0_i32, %c0_i32_0 : i32, i32
  }
  func.func @transform_2(%arg0: i32) -> (i32, i32) {
    %c0_i32 = arith.constant 0 : i32
    %c0_i32_0 = arith.constant 0 : i32
    %c0_i32_1 = arith.constant 0 : i32
    return %c0_i32, %c0_i32_0 : i32, i32
  }
  func.func @transform_3(%arg0: i32) -> (i32, i32) {
    %c0_i32 = arith.constant 0 : i32
    %c0_i32_0 = arith.constant 0 : i32
    %c0_i32_1 = arith.constant 0 : i32
    return %c0_i32, %c0_i32_0 : i32, i32
  }
  func.func @transform_4(%arg0: i32) -> (i32, i32, i32) {
    %c0_i32 = arith.constant 0 : i32
    %c0_i32_0 = arith.constant 0 : i32
    %c0_i32_1 = arith.constant 0 : i32
    %c0_i32_2 = arith.constant 0 : i32
    return %c0_i32, %c0_i32_0, %c0_i32_1 : i32, i32, i32
  }
}

</mosaic_0001>

<bundles_post_ra>
// kernel: tpu_custom_call.1
= control target key start
LH: loop header
LB: loop body
LE: loop exit
PB: predicated region body
PF: predicated region fallthrough
CT: control target
= control target key end

     0   :  { %9 = vsyncpa [#allocation4], 0  ;;  %s1214_s0 = inlined_call_operand.hbm [shape: bf16[4,8,260], index: 0, kind: input, shape index: {}]   ;;  %s1215_s1 = inlined_call_operand.vmem [shape: bf16[16,40], index: 1, kind: input, shape index: {}]   ;;  %s1216_s2 = inlined_call_operand.vmem [shape: f32[16,1], index: 2, kind: input, shape index: {}]   ;;  %s1217_s3 = inlined_call_operand.vmem [shape: f32[16,1], index: 3, kind: input, shape index: {}]   ;;  %s1218_s4 = inlined_call_operand.hbm [shape: f32[4,16,256], index: 4, kind: output, shape index: {}]  }
   0x1   :  { %11 = vsyncpa [#allocation4 + $0x1], 0 }
   0x2   :  { %12 = vsyncpa [#allocation5], 0  ;;  %s1014_s15 = smov 0   ;;  %s1016_s16 = smov 0  }
   0x3   :  { %s1018_s17 = smov 0   ;;  %s1020_s18 = smov 0  }
   0x4 LB: > { %s1033_s19 = sadd.s32 4294967295, %s972_s18   ;;  %s1036_s20 = sadd.s32 1, %s972_s18   ;;  %s972_s18 = sphi %s1020_s18, %s1225_s18   ;;  %s968_s17 = sphi %s1018_s17, %s1224_s17   ;;  %s964_s16 = sphi %s1016_s16, %s1223_s16   ;;  %s960_s15 = sphi %s1014_s15, %s1222_s15  }
   0x5   : > { %s22_s21 = ssub.s32 %s972_s18, %s1036_s20  ;;  %s25_s22 = sadd.s32 1, %s968_s17 }
   0x6   : > { %p23_p0 = scmp.eq.s32.totalorder %s22_s21, 0  ;;  %p32_p1 = scmp.ne.s32.totalorder %s968_s17, %s964_s16 }
   0x7   : > { %p33_p2 = scmp.eq.s32.totalorder %s972_s18, 0  ;;  %p38_p3 = scmp.ne.s32.totalorder %s964_s16, %s960_s15 }
   0x8   : > { %s1046_s23 = scalar_select %p23_p0, %s968_s17, %s25_s22  }
   0x9   : > { %p34_p4 = por %p33_p2, %p32_p1  ;;  %p39_p5 = scmp.eq.s32.totalorder %s1033_s19, 0 }
   0xa   : > { %p816_p6 = scmp.lt.s32.totalorder %s972_s18, 2  ;;  %s155_s25 = sand.u32 1, %s968_s17  }
   0xb   : > { %p1050_p7 = por %p39_p5, %p38_p3  ;;  %s803_s26 = smul.u32 24, %s155_s25 }
   0xc   : > { %s804_s27 = smul.u32 384, %s972_s18  ;;  %p1056_p8 = pnand %p816_p6, %p34_p4 }
   0xd   : > { %s159_s6 = scalar_lea.vmem [#allocation3], %s803_s26  ;;  %s1068_s8 = scalar_lea.sflag [#allocation4], %s155_s25 }
   0xe   : > { %s1063_s5 = scalar_lea.hbm %s1214_s0, %s804_s27  ;;  %s167_s7 = sshll.u32 %s159_s6, 4  ;;  %s1065_s7 = int_to_ptr.vmem [resolvable:$true] %s167_s7 }
   0xf   : > { %s878_s9 = scalar_lea.hbm %s1063_s5, 384  ;;  %p880_p11 = pneg %p1056_p8 }
  0x10   : > { %p879_p10 = scmp.ne.s32.totalorder %s1063_s5, %s878_s9  ;;  %s883_s12 = scalar_lea.hbm %s1214_s0, 768 }
  0x11   : > { %p884_p0 = scmp.lt.u32.totalorder %s1063_s5, %s1214_s0  ;;  %p885_p1 = scmp.lt.u32.totalorder %s883_s12, %s878_s9 }
  0x12   : > { %p881_p12 = pnand %p880_p11, %p879_p10  ;;  %p887_p3 = scmp.lt.u32.totalorder %s878_s9, %s1063_s5 }
  0x13   : > { %p886_p2 = por %p885_p1, %p884_p0 }
  0x14   : > { %p882_p13 = pneg %p881_p12 }
  0x15   : > { %p888_p4 = por %p887_p3, %p886_p2 }
  0x17   : > { %p889_p5 = pnand %p888_p4, %p882_p13 }
  0x19   : > { %892 = shalt.err (!%p889_p5)
}
  0x1a   : > { %s893_s15 = scalar_lea.vmem %s1065_s7, 384  ;;  %s974_s21 = smov [#allocation3]  }
  0x1b   : > { %p894_p6 = scmp.ne.s32.totalorder %s1065_s7, %s893_s15  ;;  %s898_s22 = sshll.u32 %s974_s21, 4  ;;  %s899_s22 = int_to_ptr.vmem [resolvable:$false] %s898_s22 }
  0x1c   : > { %s900_s25 = scalar_lea.vmem %s899_s22, 768  ;;  %p901_p9 = scmp.lt.s32.totalorder %s1065_s7, %s899_s22 }
  0x1d   : > { %p896_p10 = pnand %p894_p6, %p880_p11  ;;  %p902_p0 = scmp.lt.s32.totalorder %s900_s25, %s893_s15 }
  0x1f   : > { %p897_p12 = pneg %p896_p10  ;;  %p903_p1 = por %p902_p0, %p901_p9 }
  0x21   : > { %p904_p2 = pnand %p903_p1, %p897_p12 }
  0x23   : > { %907 = shalt.err (!%p904_p2)
}
  0x24   : > { %s975_s26 = smov 192   ;;  %s976_s27 = smov 12  }
  0x25   : > { %815 = dma.hbm_to_vmem [thread:$0]  (!%p1056_p8), %s1063_s5, 384, %s1065_s7, %s1068_s8, %s975_s26, %s975_s26, %s976_s27  }
  0x26   : > { %p175_p11 = scmp.lt.s32.totalorder %s972_s18, 3  ;;  %p1221_p13 = scmp.ge.s32.totalorder %s972_s18, 1 }
  0x28   : > { %p176_p3 = pnand %p1221_p13, %p175_p11 }
  0x29   : > { %s181_s29 = sand.u32 (!%p176_p3), 1, %s964_s16  }
  0x2a   : > { %179 = sbr.rel (%p176_p3) target bundleno = 1036 (0x40c), region = 36  ;;  %s182_s6 = scalar_lea.sflag (!%p176_p3), [#allocation4], %s181_s29 }
  0x2b   : > { %s805_s30 = smul.u32 (!%p176_p3), 24, %s181_s29 }
  0x2d   : > { %s185_s9 = scalar_lea.vmem (!%p176_p3), [#allocation3], %s805_s30 }
  0x31   : > { %951 = dma.done.wait (%p1050_p7), %s182_s6, 384  }
  0x32   : > { %953 = vsyncadd (%p1050_p7), %s182_s6, 4294966912  ;;  %p774_p9 = scmp.ne.s32.totalorder %s1033_s19, 0 }
  0x33   : > { %vm211_vm0 = vcmask (!%p774_p9), 15360   ;;  %v977_v0 = vmov (!%p774_p9), 0.0  }
  0x34   : > { %210 = sbr.rel (%p774_p9) target bundleno = 59 (0x3b), region = 44  ;;  %212 = vst.msk [vmem:[#allocation2] sm:$0xff] (!%p774_p9), %vm211_vm0, %v977_v0  ;;  %213 = vst.msk [vmem:[#allocation2 + $0x8] sm:$0xff] (!%p774_p9), %vm211_vm0, %v977_v0 }
  0x3b PF: > { %v214_v1 = vld [vmem:[%s185_s9] sm:$0xff]  ;;  %v216_v4 = vld [vmem:[%s185_s9 + $0xc] sm:$0xff]  ;;  %s978_s18 = smov 127   ;;  %v867_v5 = vld [vmem:[%s185_s9 + $0x8] ss:$0 sps:$4 sm:$0xff]   ;;  %s979_s24 = smov 126  }
  0x3c   : > { %v776_v2 = vcombine.high %v214_v1, %v214_v1  ;;  %v775_v3 = vcombine.low %v214_v1, %v214_v1  ;;  %v779_v6 = vcombine.high %v216_v4, %v216_v4  ;;  %v869_v7 = vld [vmem:[%s185_s9 + $0x14] ss:$0 sps:$4 sm:$0xff]   ;;  %s980_s28 = smov 125   ;;  %v778_v8 = vcombine.low %v216_v4, %v216_v4  ;;  %s982_s5 = smov 124  }
  0x3d   : > { %v981_v9 = vmov 0   ;;  %vm234_vm1 = vcmask 1039360   ;;  %vm264_vm2 = vcmask 1043456   ;;  %vm243_vm3 = vcmask 1031168   ;;  %v871_v55 = vld [vmem:[%s1215_s1] sm:$0xff]   ;;  %s801_s10 = sshll.u32 %s1033_s19, 6 }
  0x3e   : > { %230 = vrot.lane.b32.xlu0 %v776_v2, %s978_s18  ;;  %228 = vrot.lane.b32.xlu1 %v775_v3, %s978_s18  ;;  %vm252_vm4 = vcmask 1022976   ;;  %vm261_vm5 = vcmask 1014784   ;;  %vm342_vm6 = vcmask 326656   ;;  %s485_s11 = scalar_lea.vmem [#allocation6], %s801_s10  ;;  %vm474_vm7 = vcmask 7168   ;;  %p795_p7 = scmp.ne.s32.totalorder %s1033_s19, 1 }
  0x3f   : > { %390 = vmatprep.mubr.bf16.mxu0 %v981_v9  ;;  %433 = vmatprep.mubr.bf16.mxu1 %v981_v9  ;;  %vm479_vm8 = vcmask 15360   ;;  %s983_s12 = smov (!%p795_p7), 1   ;;  %s985_s13 = smov (!%p795_p7), 127  }
  0x42   : > { %232 = vrot.lane.b32.xlu0 %v867_v5, %s978_s18  ;;  %291 = vrot.lane.b32.xlu1 %v779_v6, %s978_s18 }
  0x46   : > { %293 = vrot.lane.b32.xlu0 %v869_v7, %s978_s18  ;;  %239 = vrot.lane.b32.xlu1 %v776_v2, %s979_s24 }
  0x4a   : > { %241 = vrot.lane.b32.xlu0 %v867_v5, %s979_s24  ;;  %248 = vrot.lane.b32.xlu1 %v776_v2, %s980_s28 }
  0x4e   : > { %250 = vrot.lane.b32.xlu0 %v867_v5, %s980_s28  ;;  %289 = vrot.lane.b32.xlu1 %v778_v8, %s978_s18 }
  0x52   : > { %237 = vrot.lane.b32.xlu0 %v775_v3, %s979_s24  ;;  %246 = vrot.lane.b32.xlu1 %v775_v3, %s980_s28 }
  0x56   : > { %299 = vrot.lane.b32.xlu0 %v779_v6, %s979_s24  ;;  %301 = vrot.lane.b32.xlu1 %v869_v7, %s979_s24 }
  0x5a   : > { %307 = vrot.lane.b32.xlu0 %v779_v6, %s980_s28  ;;  %309 = vrot.lane.b32.xlu1 %v869_v7, %s980_s28 }
  0x5e   : > { %297 = vrot.lane.b32.xlu0 %v778_v8, %s979_s24  ;;  %305 = vrot.lane.b32.xlu1 %v778_v8, %s980_s28 }
  0x62   : > { %255 = vrot.lane.b32.xlu0 %v775_v3, %s982_s5  ;;  %257 = vrot.lane.b32.xlu1 %v776_v2, %s982_s5 }
  0x66   : > { %259 = vrot.lane.b32.xlu0 %v867_v5, %s982_s5  ;;  %313 = vrot.lane.b32.xlu1 %v778_v8, %s982_s5 }
  0x6a   : > { %315 = vrot.lane.b32.xlu0 %v779_v6, %s982_s5  ;;  %317 = vrot.lane.b32.xlu1 %v869_v7, %s982_s5 }
  0xb0   : > { %v231_v10 = vpop.permute.xlu0 %230  ;;  %v229_v11 = vpop.permute.xlu1 %228 }
  0xb1   : > { %v235_v12 = vsel %vm234_vm1, %v229_v11, %v231_v10 }
  0xb2   : > { %v267_v17 = vsel %vm264_vm2, %v775_v3, %v235_v12 }
  0xb4   : > { %v233_v13 = vpop.permute.xlu0 %232  ;;  %v292_v14 = vpop.permute.xlu1 %291 }
  0xb5   : > { %v236_v15 = vsel %vm234_vm1, %v231_v10, %v233_v13 }
  0xb6   : > { %v271_v16 = vsel %vm264_vm2, %v776_v2, %v236_v15 }
  0xb7   : > { %358 = vmatprep.subr.bf16.mxu0 %v271_v16 }
  0xb8   : > { %v294_v18 = vpop.permute.xlu0 %293  ;;  %359 = vmatpush1.bf16.msra.mxu0 %v267_v17  ;;  %v240_v19 = vpop.permute.xlu1 %239 }
  0xb9   : > { %v296_v20 = vsel %vm234_vm1, %v292_v14, %v294_v18 }
  0xba   : > { %v327_v21 = vsel %vm264_vm2, %v779_v6, %v296_v20 }
  0xbb   : > { %401 = vmatprep.subr.bf16.mxu1 %v327_v21 }
  0xbc   : > { %v242_v22 = vpop.permute.xlu0 %241  ;;  %v249_v23 = vpop.permute.xlu1 %248 }
  0xbd   : > { %v245_v26 = vsel %vm243_vm3, %v240_v19, %v242_v22 }
  0xc0   : > { %v251_v24 = vpop.permute.xlu0 %250  ;;  %v290_v25 = vpop.permute.xlu1 %289 }
  0xc1   : > { %v254_v27 = vsel %vm252_vm4, %v249_v23, %v251_v24  ;;  %v295_v28 = vsel %vm234_vm1, %v290_v25, %v292_v14 }
  0xc2   : > { %v279_v29 = vsel %vm264_vm2, %v245_v26, %v254_v27  ;;  %v323_v30 = vsel %vm264_vm2, %v778_v8, %v295_v28  ;;  %v472_v26 = vld [vmem:[#allocation2] sm:$0xff] }
  0xc3   : > { %360 = vmatprep.subr.bf16.mxu0 %v279_v29  ;;  %402 = vmatpush1.bf16.msra.mxu1 %v323_v30  ;;  %v473_v30 = vld [vmem:[#allocation2 + $0x8] sm:$0xff] }
  0xc4   : > { %v238_v31 = vpop.permute.xlu0 %237  ;;  %v247_v32 = vpop.permute.xlu1 %246 }
  0xc5   : > { %v244_v33 = vsel %vm243_vm3, %v238_v31, %v240_v19  ;;  %v253_v34 = vsel %vm252_vm4, %v247_v32, %v249_v23 }
  0xc6   : > { %v275_v35 = vsel %vm264_vm2, %v244_v33, %v253_v34 }
  0xc7   : > { %361 = vmatpush1.bf16.msra.mxu0 %v275_v35 }
  0xc8   : > { %v300_v36 = vpop.permute.xlu0 %299  ;;  %v302_v37 = vpop.permute.xlu1 %301 }
  0xc9   : > { %v304_v40 = vsel %vm243_vm3, %v300_v36, %v302_v37 }
  0xcc   : > { %v308_v38 = vpop.permute.xlu0 %307  ;;  %v310_v39 = vpop.permute.xlu1 %309 }
  0xcd   : > { %v312_v41 = vsel %vm252_vm4, %v308_v38, %v310_v39 }
  0xce   : > { %v335_v42 = vsel %vm264_vm2, %v304_v40, %v312_v41 }
  0xcf   : > { %403 = vmatprep.subr.bf16.mxu1 %v335_v42 }
  0xd0   : > { %v298_v43 = vpop.permute.xlu0 %297  ;;  %v306_v44 = vpop.permute.xlu1 %305 }
  0xd1   : > { %v303_v45 = vsel %vm243_vm3, %v298_v43, %v300_v36  ;;  %v311_v46 = vsel %vm252_vm4, %v306_v44, %v308_v38 }
  0xd2   : > { %v331_v47 = vsel %vm264_vm2, %v303_v45, %v311_v46  ;;  %v984_v45 = vmov (!%p795_p7), 0  }
  0xd3   : > { %404 = vmatpush1.bf16.msra.mxu1 %v331_v47  ;;  %872 = vset.pattern.permute.xlu0 (!%p795_p7), %v984_v45 }
  0xd4   : > { %v256_v48 = vpop.permute.xlu0 %255  ;;  %v258_v49 = vpop.permute.xlu1 %257  ;;  %873 = vset.pattern.permute.xlu1 (!%p795_p7), %v984_v45 }
  0xd5   : > { %v262_v50 = vsel %vm261_vm5, %v256_v48, %v258_v49 }
  0xd6   : > { %v347_v54 = vsel %vm264_vm2, %v262_v50, 0  ;;  %v518_v50 = vld [vmem:[%s1216_s2] sm:$0xff] (!%p795_p7) }
  0xd8   : > { %v260_v51 = vpop.permute.xlu0 %259  ;;  %v314_v52 = vpop.permute.xlu1 %313 }
  0xd9   : > { %v263_v53 = vsel %vm261_vm5, %v258_v49, %v260_v51 }
  0xda   : > { %782 = vmatprep.subr.msk.bf16.mxu0 %vm264_vm2, %v263_v53  ;;  %v534_v53 = vld [vmem:[%s1217_s3] sm:$0xff] (!%p795_p7) }
  0xdb   : > { %363 = vmatpush1.bf16.msra.mxu0 %v347_v54  ;;  %v519_v54 = vld [vmem:[%s1216_s2 + $0x8] sm:$0xff] (!%p795_p7) }
  0xdc   : > { %v316_v56 = vpop.permute.xlu0 %315  ;;  %v318_v57 = vpop.permute.xlu1 %317 }
  0xdd   : > { %v319_v58 = vsel %vm261_vm5, %v314_v52, %v316_v56  ;;  %v320_v59 = vsel %vm261_vm5, %v316_v56, %v318_v57 }
  0xde   : > { %783 = vmatmul.mubr.msk.bf16.vlgmr.msra.gmra.mrb[0].mxu0 %vm342_vm6, %v871_v55  ;;  %784 = vmatprep.subr.msk.bf16.mxu1 %vm264_vm2, %v320_v59  ;;  %v353_v60 = vsel %vm264_vm2, %v319_v58, 0  ;;  %v535_v59 = vld [vmem:[%s1217_s3 + $0x8] sm:$0xff] (!%p795_p7) }
  0xdf   : > { %406 = vmatpush1.bf16.msra.mxu1 %v353_v60 }
  0xe2   : > { %785 = vmatmul.mubr.msk.bf16.vlgmr.msra.gmra.mrb[0].mxu1 %vm342_vm6, %v871_v55 }
 0x1b1   : > { %v392_v61 = vpop.f32.mrb[0].mxu0 }
 0x1b2   : > { %v454_v62 = vmul.f32 %v392_v61, %v392_v61  ;;  %486 = vst [vmem:[%s485_s11] sm:$0xff] %v392_v61  ;;  %v394_v63 = vpop.f32.mrb[1].mxu0 }
 0x1b3   : > { %v444_v0 = vadd.f32 %v394_v63, %v392_v61  ;;  %v455_v1 = vmul.f32 %v394_v63, %v394_v63  ;;  %487 = vst [vmem:[%s485_s11 + $0x8] sm:$0xff] %v394_v63  ;;  %v396_v2 = vpop.f32.mrb[2].mxu0 }
 0x1b4   : > { %v458_v3 = vmul.f32 %v396_v2, %v396_v2  ;;  %488 = vst [vmem:[%s485_s11 + $0x10] sm:$0xff] %v396_v2  ;;  %v398_v4 = vpop.f32.mrb[3].mxu0 }
 0x1b5   : > { %v449_v5 = vadd.f32 %v398_v4, %v396_v2  ;;  %v459_v6 = vmul.f32 %v398_v4, %v398_v4  ;;  %489 = vst [vmem:[%s485_s11 + $0x18] sm:$0xff] %v398_v4  ;;  %v435_v7 = vpop.f32.mrb[0].mxu1  ;;  %v462_v8 = vadd.f32 %v455_v1, %v454_v62 }
 0x1b6   : > { %v456_v9 = vmul.f32 %v435_v7, %v435_v7  ;;  %791 = vst [vmem:[%s485_s11 + $0x20] sm:$0xff] %v435_v7  ;;  %v437_v10 = vpop.f32.mrb[1].mxu1  ;;  %v445_v11 = vadd.f32 %v444_v0, %v435_v7 }
 0x1b7   : > { %v467_v12 = vadd.f32 %v459_v6, %v458_v3  ;;  %792 = vst [vmem:[%s485_s11 + $0x28] sm:$0xff] %v437_v10  ;;  %v439_v13 = vpop.f32.mrb[2].mxu1  ;;  %v457_v14 = vmul.f32 %v437_v10, %v437_v10 }
 0x1b8   : > { %v460_v15 = vmul.f32 %v439_v13, %v439_v13  ;;  %793 = vst [vmem:[%s485_s11 + $0x30] sm:$0xff] %v439_v13  ;;  %v441_v16 = vpop.f32.mrb[3].mxu1  ;;  %v446_v17 = vadd.f32 %v445_v11, %v437_v10  ;;  %v450_v18 = vadd.f32 %v449_v5, %v439_v13  ;;  %v463_v19 = vadd.f32 %v462_v8, %v456_v9 }
 0x1b9   : > { %v461_v20 = vmul.f32 %v441_v16, %v441_v16  ;;  %794 = vst [vmem:[%s485_s11 + $0x38] sm:$0xff] %v441_v16 }
 0x1ba   : > { %447 = vadd.xlane.f32.xlu0 %v446_v17  ;;  %v451_v21 = vadd.f32 %v450_v18, %v441_v16  ;;  %v464_v22 = vadd.f32 %v463_v19, %v457_v14  ;;  %v468_v23 = vadd.f32 %v467_v12, %v460_v15 }
 0x1bc   : > { %452 = vadd.xlane.f32.xlu1 %v451_v21  ;;  %v469_v24 = vadd.f32 %v468_v23, %v461_v20 }
 0x1be   : > { %465 = vadd.xlane.f32.xlu0 %v464_v22 }
 0x1c0   : > { %v540_v2 = vld [vmem:[#allocation6] sm:$0xff] (!%p795_p7)  ;;  %v541_v3 = vld [vmem:[#allocation6 + $0x8] sm:$0xff] (!%p795_p7)  ;;  %v542_v11 = vld [vmem:[#allocation6 + $0x10] sm:$0xff] (!%p795_p7) }
 0x1c1   : > { %v544_v4 = vld [vmem:[#allocation6 + $0x20] sm:$0xff] (!%p795_p7)  ;;  %v545_v5 = vld [vmem:[#allocation6 + $0x28] sm:$0xff] (!%p795_p7)  ;;  %v543_v12 = vld [vmem:[#allocation6 + $0x18] sm:$0xff] (!%p795_p7) }
 0x1c2   : > { %470 = vadd.xlane.f32.xlu0 %v469_v24  ;;  %v548_v7 = vld [vmem:[#allocation6 + $0x40] sm:$0xff] (!%p795_p7)  ;;  %v549_v8 = vld [vmem:[#allocation6 + $0x48] sm:$0xff] (!%p795_p7)  ;;  %v546_v14 = vld [vmem:[#allocation6 + $0x30] sm:$0xff] (!%p795_p7) }
 0x1c3   : > { %v552_v9 = vld [vmem:[#allocation6 + $0x60] sm:$0xff] (!%p795_p7)  ;;  %v553_v10 = vld [vmem:[#allocation6 + $0x68] sm:$0xff] (!%p795_p7)  ;;  %v547_v15 = vld [vmem:[#allocation6 + $0x38] sm:$0xff] (!%p795_p7) }
 0x1c4   : > { %v550_v16 = vld [vmem:[#allocation6 + $0x50] sm:$0xff] (!%p795_p7)  ;;  %v551_v21 = vld [vmem:[#allocation6 + $0x58] sm:$0xff] (!%p795_p7) }
 0x1c5   : > { %v554_v22 = vld [vmem:[#allocation6 + $0x70] sm:$0xff] (!%p795_p7)  ;;  %v555_v23 = vld [vmem:[#allocation6 + $0x78] sm:$0xff] (!%p795_p7) }
 0x247   : > { %v448_v25 = vpop.xlane.xlu0 %447 }
 0x249   : > { %v453_v31 = vpop.xlane.xlu1 %452 }
 0x24b   : > { %v466_v27 = vpop.xlane.xlu0 %465 }
 0x24c   : > { %v475_v28 = vsel %vm474_vm7, %v448_v25, %v466_v27 }
 0x24d   : > { %v477_v29 = vadd.f32 %v475_v28, %v472_v26  ;;  %501 = sbr.rel (%p795_p7) target bundleno = 1010 (0x3f2), region = 48 }
 0x24f   : > { %480 = vst.msk [vmem:[#allocation2] sm:$0xff] %vm479_vm8, %v477_v29  ;;  %v471_v32 = vpop.xlane.xlu0 %470 }
 0x250   : > { %v476_v33 = vsel %vm474_vm7, %v453_v31, %v471_v32 }
 0x251   : > { %v478_v34 = vadd.f32 %v476_v33, %v473_v30 }
 0x253   : > { %481 = vst.msk [vmem:[#allocation2 + $0x8] sm:$0xff] %vm479_vm8, %v478_v34 }
 0x256   : > { %v502_v35 = vld [vmem:[#allocation2] sm:$0xff] }
 0x257   : > { %v504_v37 = vmul.f32 0.0009765625, %v502_v35 }
 0x259   : > { %v506_v39 = vmul.f32 %v504_v37, %v504_v37 }
 0x25a   : > { %v503_v36 = vld [vmem:[#allocation2 + $0x8] sm:$0xff] }
 0x25b   : > { %v505_v38 = vmul.f32 0.0009765625, %v503_v36  ;;  %510 = vrot.lane.b32.xlu0 %v506_v39, %s983_s12 }
 0x25d   : > { %v507_v40 = vmul.f32 %v505_v38, %v505_v38 }
 0x25f   : > { %512 = vrot.lane.b32.xlu0 %v507_v40, %s983_s12 }
 0x2cd   : > { %v511_v41 = vpop.permute.xlu0 %510 }
 0x2ce   : > { %v516_v42 = vsub.f32 %v504_v37, %v511_v41 }
 0x2d0   : > { %v520_v43 = vadd.f32 1e-05, %v516_v42 }
 0x2d1   : > { %v513_v44 = vpop.permute.xlu0 %512 }
 0x2d2   : > { %874 = vrsqrt.f32 %v520_v43  ;;  %v517_v46 = vsub.f32 %v505_v38, %v513_v44 }
 0x2d4   : > { %v521_v47 = vadd.f32 1e-05, %v517_v46 }
 0x2d6   : > { %876 = vrsqrt.f32 %v521_v47 }
 0x2dc   : > { %v875_v48 = vpop.eup %874 }
 0x2dd   : > { %526 = vrot.lane.b32.xlu1 %v875_v48, %s985_s13 }
 0x2e0   : > { %v877_v49 = vpop.eup %876 }
 0x2e1   : > { %528 = vrot.lane.b32.xlu1 %v877_v49, %s985_s13 }
 0x34f   : > { %v527_v51 = vpop.permute.xlu1 %526 }
 0x350   : > { %v532_v52 = vmul.f32 %v527_v51, %v518_v50 }
 0x352   : > { %v536_v55 = vmul.f32 %v532_v52, %v504_v37  ;;  %558 = vperm.xlu0 %872, %v532_v52  }
 0x353   : > { %v529_v56 = vpop.permute.xlu1 %528 }
 0x354   : > { %v538_v57 = vsub.f32 %v534_v53, %v536_v55  ;;  %v533_v58 = vmul.f32 %v529_v56, %v519_v54 }
 0x356   : > { %v537_v60 = vmul.f32 %v533_v58, %v505_v38  ;;  %563 = vperm.xlu1 %873, %v533_v58   ;;  %v582_v61 = vsub.f32 0.0, %v538_v57 }
 0x358   : > { %v539_v62 = vsub.f32 %v535_v59, %v537_v60  ;;  %v584_v63 = vmul.f32 0.0, %v582_v61 }
 0x35a   : > { %588 = vperm.xlu1 %873, %v584_v63   ;;  %v583_v0 = vsub.f32 0.0, %v539_v62 }
 0x35c   : > { %v585_v1 = vmul.f32 0.0, %v583_v0 }
 0x35e   : > { %630 = vperm.xlu1 %873, %v538_v57   ;;  %593 = vperm.xlu0 %872, %v585_v1  }
 0x362   : > { %635 = vperm.xlu0 %872, %v539_v62  }
 0x3d1   : > { %v559_v6 = vpop.permute.xlu0 %558 }
 0x3d2   : > { %v566_v17 = vmul.f32 %v559_v6, %v540_v2  ;;  %v567_v18 = vmul.f32 %v559_v6, %v541_v3  ;;  %v570_v19 = vmul.f32 %v559_v6, %v544_v4  ;;  %v571_v20 = vmul.f32 %v559_v6, %v545_v5 }
 0x3d3   : > { %v574_v24 = vmul.f32 %v559_v6, %v548_v7  ;;  %v575_v25 = vmul.f32 %v559_v6, %v549_v8  ;;  %v578_v26 = vmul.f32 %v559_v6, %v552_v9  ;;  %v579_v27 = vmul.f32 %v559_v6, %v553_v10 }
 0x3d5   : > { %v564_v13 = vpop.permute.xlu1 %563 }
 0x3d6   : > { %v1146_v28 = vmul.f32 %v564_v13, %v542_v11  ;;  %v1148_v29 = vmul.f32 %v564_v13, %v543_v12  ;;  %v1150_v30 = vmul.f32 %v564_v13, %v546_v14  ;;  %v1152_v31 = vmul.f32 %v564_v13, %v547_v15 }
 0x3d7   : > { %v1154_v33 = vmul.f32 %v564_v13, %v550_v16  ;;  %v1156_v34 = vmul.f32 %v564_v13, %v551_v21  ;;  %v1158_v35 = vmul.f32 %v564_v13, %v554_v22  ;;  %v1160_v36 = vmul.f32 %v564_v13, %v555_v23 }
 0x3d9   : > { %v589_v32 = vpop.permute.xlu1 %588 }
 0x3da   : > { %v596_v37 = vmax.f32 %v566_v17, %v589_v32  ;;  %v597_v38 = vmax.f32 %v567_v18, %v589_v32  ;;  %v600_v39 = vmax.f32 %v570_v19, %v589_v32  ;;  %v601_v40 = vmax.f32 %v571_v20, %v589_v32 }
 0x3db   : > { %v604_v41 = vmax.f32 %v574_v24, %v589_v32  ;;  %v605_v42 = vmax.f32 %v575_v25, %v589_v32  ;;  %v608_v43 = vmax.f32 %v578_v26, %v589_v32  ;;  %v609_v44 = vmax.f32 %v579_v27, %v589_v32 }
 0x3dc   : > { %v612_v45 = vmul.f32 0.0, %v596_v37  ;;  %v613_v46 = vmul.f32 0.0, %v597_v38  ;;  %v616_v47 = vmul.f32 0.0, %v600_v39  ;;  %v617_v48 = vmul.f32 0.0, %v601_v40 }
 0x3dd   : > { %v631_v49 = vpop.permute.xlu1 %630  ;;  %v620_v50 = vmul.f32 0.0, %v604_v41  ;;  %v621_v51 = vmul.f32 0.0, %v605_v42  ;;  %v624_v52 = vmul.f32 0.0, %v608_v43  ;;  %v625_v53 = vmul.f32 0.0, %v609_v44  ;;  %v594_v62 = vpop.permute.xlu0 %593 }
 0x3de   : > { %v638_v54 = vadd.f32 %v631_v49, %v566_v17  ;;  %v639_v55 = vadd.f32 %v631_v49, %v567_v18  ;;  %v642_v56 = vadd.f32 %v631_v49, %v570_v19  ;;  %v643_v57 = vadd.f32 %v631_v49, %v571_v20 }
 0x3df   : > { %v646_v58 = vadd.f32 %v631_v49, %v574_v24  ;;  %v647_v59 = vadd.f32 %v631_v49, %v575_v25  ;;  %v650_v60 = vadd.f32 %v631_v49, %v578_v26  ;;  %v651_v61 = vadd.f32 %v631_v49, %v579_v27 }
 0x3e0   : > { %v654_v63 = vmax.f32 %v638_v54, 0.0  ;;  %v655_v0 = vmax.f32 %v639_v55, 0.0  ;;  %v658_v1 = vmax.f32 %v642_v56, 0.0  ;;  %v659_v2 = vmax.f32 %v643_v57, 0.0 }
 0x3e1   : > { %v662_v3 = vmax.f32 %v646_v58, 0.0  ;;  %v663_v4 = vmax.f32 %v647_v59, 0.0  ;;  %v666_v5 = vmax.f32 %v650_v60, 0.0  ;;  %v667_v6 = vmax.f32 %v651_v61, 0.0  ;;  %v636_v23 = vpop.permute.xlu0 %635 }
 0x3e2   : > { %v670_v7 = vadd.f32 %v654_v63, %v612_v45  ;;  %v671_v8 = vadd.f32 %v655_v0, %v613_v46  ;;  %v674_v9 = vadd.f32 %v658_v1, %v616_v47  ;;  %v675_v10 = vadd.f32 %v659_v2, %v617_v48 }
 0x3e3   : > { %v678_v11 = vadd.f32 %v662_v3, %v620_v50  ;;  %v679_v12 = vadd.f32 %v663_v4, %v621_v51  ;;  %v682_v13 = vadd.f32 %v666_v5, %v624_v52  ;;  %v683_v14 = vadd.f32 %v667_v6, %v625_v53 }
 0x3e4   : > { %686 = vst [vmem:[#allocation6] sm:$0xff] %v670_v7  ;;  %687 = vst [vmem:[#allocation6 + $0x8] sm:$0xff] %v671_v8  ;;  %v598_v15 = vmax.f32 %v1146_v28, %v594_v62  ;;  %v599_v16 = vmax.f32 %v1148_v29, %v594_v62  ;;  %v602_v17 = vmax.f32 %v1150_v30, %v594_v62 }
 0x3e5   : > { %690 = vst [vmem:[#allocation6 + $0x20] sm:$0xff] %v674_v9  ;;  %691 = vst [vmem:[#allocation6 + $0x28] sm:$0xff] %v675_v10  ;;  %v603_v18 = vmax.f32 %v1152_v31, %v594_v62  ;;  %v606_v19 = vmax.f32 %v1154_v33, %v594_v62  ;;  %v607_v20 = vmax.f32 %v1156_v34, %v594_v62 }
 0x3e6   : > { %694 = vst [vmem:[#allocation6 + $0x40] sm:$0xff] %v678_v11  ;;  %695 = vst [vmem:[#allocation6 + $0x48] sm:$0xff] %v679_v12  ;;  %v610_v21 = vmax.f32 %v1158_v35, %v594_v62  ;;  %v611_v22 = vmax.f32 %v1160_v36, %v594_v62  ;;  %v614_v24 = vmul.f32 0.0, %v598_v15  ;;  %v615_v25 = vmul.f32 0.0, %v599_v16 }
 0x3e7   : > { %698 = vst [vmem:[#allocation6 + $0x60] sm:$0xff] %v682_v13  ;;  %699 = vst [vmem:[#allocation6 + $0x68] sm:$0xff] %v683_v14  ;;  %v618_v26 = vmul.f32 0.0, %v602_v17  ;;  %v619_v27 = vmul.f32 0.0, %v603_v18  ;;  %v622_v32 = vmul.f32 0.0, %v606_v19  ;;  %v623_v37 = vmul.f32 0.0, %v607_v20 }
 0x3e8   : > { %v626_v38 = vmul.f32 0.0, %v610_v21  ;;  %v627_v39 = vmul.f32 0.0, %v611_v22  ;;  %v640_v40 = vadd.f32 %v636_v23, %v1146_v28  ;;  %v641_v41 = vadd.f32 %v636_v23, %v1148_v29 }
 0x3e9   : > { %v644_v42 = vadd.f32 %v636_v23, %v1150_v30  ;;  %v645_v43 = vadd.f32 %v636_v23, %v1152_v31  ;;  %v648_v44 = vadd.f32 %v636_v23, %v1154_v33  ;;  %v649_v45 = vadd.f32 %v636_v23, %v1156_v34 }
 0x3ea   : > { %v652_v46 = vadd.f32 %v636_v23, %v1158_v35  ;;  %v653_v47 = vadd.f32 %v636_v23, %v1160_v36  ;;  %v656_v48 = vmax.f32 %v640_v40, 0.0  ;;  %v657_v49 = vmax.f32 %v641_v41, 0.0 }
 0x3eb   : > { %v660_v50 = vmax.f32 %v644_v42, 0.0  ;;  %v661_v51 = vmax.f32 %v645_v43, 0.0  ;;  %v664_v52 = vmax.f32 %v648_v44, 0.0  ;;  %v665_v28 = vmax.f32 %v649_v45, 0.0 }
 0x3ec   : > { %v668_v53 = vmax.f32 %v652_v46, 0.0  ;;  %v669_v29 = vmax.f32 %v653_v47, 0.0  ;;  %v672_v54 = vadd.f32 %v656_v48, %v614_v24  ;;  %v673_v30 = vadd.f32 %v657_v49, %v615_v25 }
 0x3ed   : > { %v676_v55 = vadd.f32 %v660_v50, %v618_v26  ;;  %v677_v31 = vadd.f32 %v661_v51, %v619_v27  ;;  %v680_v56 = vadd.f32 %v664_v52, %v622_v32  ;;  %v681_v33 = vadd.f32 %v665_v28, %v623_v37 }
 0x3ee   : > { %v684_v57 = vadd.f32 %v668_v53, %v626_v38  ;;  %v685_v34 = vadd.f32 %v669_v29, %v627_v39  ;;  %688 = vst [vmem:[#allocation6 + $0x10] sm:$0xff] %v672_v54  ;;  %689 = vst [vmem:[#allocation6 + $0x18] sm:$0xff] %v673_v30 }
 0x3ef   : > { %692 = vst [vmem:[#allocation6 + $0x30] sm:$0xff] %v676_v55  ;;  %693 = vst [vmem:[#allocation6 + $0x38] sm:$0xff] %v677_v31 }
 0x3f0   : > { %696 = vst [vmem:[#allocation6 + $0x50] sm:$0xff] %v680_v56  ;;  %697 = vst [vmem:[#allocation6 + $0x58] sm:$0xff] %v681_v33 }
 0x3f1   : > { %700 = vst [vmem:[#allocation6 + $0x70] sm:$0xff] %v684_v57  ;;  %701 = vst [vmem:[#allocation6 + $0x78] sm:$0xff] %v685_v34 }
 0x3f2 PF: > { %p817_p8 = scmp.eq.s32.totalorder %s1033_s19, 1  ;;  %s986_s30 = smov [#allocation6]  }
 0x3f3   : > { %s708_s6 = sshll.u32 %s986_s30, 4  ;;  %s709_s6 = int_to_ptr.vmem [resolvable:$true] %s708_s6 }
 0x3f4   : > { %s908_s9 = scalar_lea.vmem %s709_s6, 2048  ;;  %p915_p10 = scmp.lt.s32.totalorder %s709_s6, %s709_s6 }
 0x3f5   : > { %p909_p4 = scmp.ne.s32.totalorder %s709_s6, %s908_s9  ;;  %p916_p12 = scmp.lt.s32.totalorder %s908_s9, %s908_s9 }
 0x3f7   : > { %p910_p5 = pnand %p909_p4, %p817_p8  ;;  %p917_p0 = por %p916_p12, %p915_p10 }
 0x3f9   : > { %p911_p6 = pneg %p910_p5 }
 0x3fb   : > { %p918_p1 = pnand %p917_p0, %p911_p6 }
 0x3fd   : > { %921 = shalt.err (!%p918_p1)
}
 0x3fe   : > { %s922_s28 = scalar_lea.hbm %s1218_s4, 2048 }
 0x3ff   : > { %p923_p2 = scmp.ne.s32.totalorder %s1218_s4, %s922_s28  ;;  %p928_p3 = scmp.lt.u32.totalorder %s922_s28, %s1218_s4 }
 0x401   : > { %p924_p11 = pnand %p923_p2, %p817_p8 }
 0x403   : > { %p925_p13 = pneg %p924_p11 }
 0x405   : > { %p930_p9 = pnand %p928_p3, %p925_p13 }
 0x407   : > { %933 = shalt.err (!%p930_p9)
}
 0x408   : > { %s987_s11 = smov 256   ;;  %s988_s12 = smov 16  }
 0x409   : > { %809 = dma.vmem_to_hbm [thread:$0]  (%p817_p8), %s709_s6, 2048, %s1218_s4, [#allocation5], %s987_s11, %s987_s11, %s988_s12  }
 0x40a   : > { %955 = dma.done.wait (%p817_p8), [#allocation5], 2048  }
 0x40b   : > { %957 = vsyncadd (%p817_p8), [#allocation5], 4294965248 }
 0x40c PF: > { %p15_p7 = scmp.ge.s32.totalorder %s1036_s20, 4   ;;  %s1222_s15 = smov %s964_s16 }
 0x40d   : > { %s1223_s16 = smov %s968_s17  ;;  %s1224_s17 = smov %s1046_s23 }
 0x40e   : > { %s1225_s18 = smov %s1036_s20  ;;  %17 = sbr.rel (!%p15_p7) target bundleno = 4 (0x4), region = 83 }
 0x415   :  { %724 = vsyncpa [#allocation4], 1 }
 0x416   :  { %726 = vsyncpa [#allocation4 + $0x1], 1 }
 0x417   :  { %727 = vsyncpa [#allocation5], 1 }
 0x418   :  { %729 = vsyncpa [#allocation5 + $0x1], 1 }

</bundles_post_ra>
